<compile_context>
chip_gen: v5e
topology: v5e:2x2
jax: 0.10.0
libtpu: 0.0.40
codegen_flags: <defaults>
</compile_context>

<pallas_src>
import jax
import jax.numpy as jnp
from jax.experimental import pallas as pl
from jax.experimental.pallas import tpu as pltpu


# ---------------------------------------------------------------------------
# Kernels
# ---------------------------------------------------------------------------
def _bcast3_kernel(x_ref, o_ref):
    # x_ref: (1, tH, Wc) -> o_ref: (3, tH, Wc)
    # Load the single-channel tile once, store it to all 3 output channels:
    # HBM traffic is 1 read + 3 writes per tile (the roofline minimum).
    x = x_ref[0]
    o_ref[0] = x
    o_ref[1] = x
    o_ref[2] = x


def _slice3_dma_kernel(x_hbm, o_hbm, sem):
    # C == 4: the first 3 channels are a contiguous slab in CHW, so move them
    # with a single HBM->HBM DMA.  No VMEM staging, no per-grid-step overhead,
    # and no lane-alignment requirements.
    cp = pltpu.make_async_copy(x_hbm.at[pl.ds(0, 3)], o_hbm, sem)
    cp.start()
    cp.wait()


# ---------------------------------------------------------------------------
# Tiling helpers
# ---------------------------------------------------------------------------
def _round_up(x, m):
    return -(-x // m) * m


def _vmem_capacity_bytes():
    try:
        return int(pltpu.get_tpu_info().vmem_capacity_bytes)
    except Exception:
        return 128 * 1024 * 1024  # v5e/v6e capacity; conservative fallback


def _sublane_multiple(itemsize):
    # Native sublane tiling packs (32 // itemsize) rows: 8 f32, 16 bf16, 32 i8.
    return max(8, 32 // max(1, itemsize))


def _lane_dense_spatial(h, w):
    """Fold (H, W) -> (H', W') with W' a multiple of 128 when possible."""
    if w % 128 == 0 or (h * w) % 128 != 0:
        return h, w
    wc = 128
    for k in (16, 8, 4, 2):  # prefer the widest lane fold that divides evenly
        if (h * w) % (128 * k) == 0:
            wc = 128 * k
            break
    return (h * w) // wc, wc


def _pick_tile_rows(h, w, itemsize, sub, target_bytes,
                    min_steps=8, min_tile_bytes=256 * 1024):
    """Row-tile height: sublane-aligned, generation-aware size, >= min_steps
    grid steps on large images, and prefers a divisor of h (no masked tail)."""
    row_bytes = max(1, w * itemsize)
    rows = max(sub, (target_bytes // row_bytes) // sub * sub)
    # Cap so big images get at least `min_steps` grid steps (read/write DMA
    # overlap + both v7x TensorCores), but never below ~min_tile_bytes/tile.
    cap = _round_up(max(1, -(-h // min_steps)), sub)
    floor_rows = max(sub, (min_tile_bytes // row_bytes) // sub * sub)
    rows = min(rows, max(cap, floor_rows))
    if rows >= h:
        return h  # full extent is always a legal block dim
    cand = rows
    while cand >= max(sub, rows // 2):
        if h % cand == 0:
            return cand
        cand -= sub
    return rows


# ---------------------------------------------------------------------------
# Wrapper
# ---------------------------------------------------------------------------
def to_three_channels(image: jax.Array,
                      *,
                      min_pallas_bytes: int = 2 * 1024 * 1024,
                      force_pallas: bool = False,
                      _tile_rows=None) -> jax.Array:
    """Pallas implementation of ToThreeChannels.forward for a CHW image."""
    C, H, W = image.shape

    if C not in (1, 4):
        return image  # PyTorch passthrough: no data movement at all

    itemsize = jnp.dtype(image.dtype).itemsize
    out_bytes = 3 * H * W * itemsize

    if C == 4 and not force_pallas:
        # Best case: return the slice and let XLA fuse it into the consumer
        # (zero materialization); even unfused, XLA emits a plain D2D copy.
        return image[:3]

    if not force_pallas and out_bytes < min_pallas_bytes:
        # Tiny images: pallas_call launch + prologue/epilogue DMA dominates.
        return jnp.tile(image, (3, 1, 1)) if C == 1 else image[:3]

    if C == 4:
        # Materialized copy requested: one contiguous HBM->HBM DMA of the
        # first-3-channel slab (no VMEM round trip).
        return pl.pallas_call(
            _slice3_dma_kernel,
            out_shape=jax.ShapeDtypeStruct((3, H, W), image.dtype),
            in_specs=[pl.BlockSpec(memory_space=pl.ANY)],
            out_specs=pl.BlockSpec(memory_space=pl.ANY),
            scratch_shapes=[pltpu.SemaphoreType.DMA(())],
        )(image)

    # ---- C == 1: broadcast kernel path ------------------------------------
    Hc, Wc = _lane_dense_spatial(H, W)  # lane-dense fold when possible
    x = image.reshape(C, Hc, Wc)

    sub = _sublane_multiple(itemsize)
    vmem_cap = _vmem_capacity_bytes()
    # v7x: 64 MiB VMEM/TC -> 2 MiB per-channel tiles; v5e/v6e (128 MiB) can
    # afford 4 MiB tiles to amortize per-step overhead further.
    target_bytes = (2 * 1024 * 1024 if vmem_cap <= 96 * 1024 * 1024
                    else 4 * 1024 * 1024)

    if _tile_rows is not None:
        tH = min(Hc, max(sub, (int(_tile_rows) // sub) * sub))
    else:
        tH = _pick_tile_rows(Hc, Wc, itemsize, sub, target_bytes)
    # NOTE: if neither W nor H*W is a multiple of 128, Wc == W (< 128, full
    # extent) and stores are masked; large greyscale images in that layout
    # are rare for this transform, so the masked fallback is acceptable.

    block_bytes = (1 + 3) * tH * Wc * itemsize  # one input + one output block
    vmem_limit = max(16 << 20, 2 * block_bytes + (4 << 20))  # double-buffered
    vmem_limit = min(vmem_limit, int(0.7 * vmem_cap))

    y = pl.pallas_call(
        _bcast3_kernel,
        out_shape=jax.ShapeDtypeStruct((3, Hc, Wc), image.dtype),
        grid=(pl.cdiv(Hc, tH),),
        in_specs=[pl.BlockSpec((1, tH, Wc), lambda h: (0, h, 0))],
        out_specs=pl.BlockSpec((3, tH, Wc), lambda h: (0, h, 0)),
        compiler_params=pltpu.CompilerParams(
            dimension_semantics=("parallel",),
            vmem_limit_bytes=vmem_limit,
        ),
    )(x)
    return y.reshape(3, H, W)


# ---------------------------------------------------------------------------
# Reference + test
# ---------------------------------------------------------------------------
def _reference(image: jnp.ndarray) -> jnp.ndarray:
    if image.shape[0] == 1:
        return jnp.tile(image, (3, 1, 1))
    elif image.shape[0] == 4:
        return image[:3]
    else:
        return image


if __name__ == "__main__":
    key = jax.random.PRNGKey(0)
    keys = jax.random.split(key, 12)

    def f32(k, s):
        return jax.random.normal(k, s, jnp.float32)

    def bf16(k, s):
        return jax.random.normal(k, s, jnp.bfloat16)

    def u8(k, s):
        return jax.random.randint(k, s, 0, 256, jnp.int32).astype(jnp.uint8)

    cases = [
        # (name, input, force_pallas, tile_rows_override)
        ("1ch small (jnp path)",   f32(keys[0], (1, 16, 16)),    False, None),
        ("4ch small (slice path)", f32(keys[1], (4, 16, 16)),    False, None),
        ("3ch identity",           f32(keys[2], (3, 16, 16)),    False, None),
        # C==1 broadcast kernel path.
        ("1ch kernel",             f32(keys[3], (1, 256, 128)),  True,  None),
        ("1ch kernel multi-tile",  f32(keys[4], (1, 256, 128)),  True,  32),
        ("1ch kernel bf16",        bf16(keys[5], (1, 128, 256)), True,  None),
        ("1ch kernel lane fold",   f32(keys[6], (1, 48, 96)),    True,  None),
        ("1ch kernel unaligned",   f32(keys[7], (1, 24, 40)),    True,  None),
        # C==4 HBM->HBM DMA kernel path (lane-alignment agnostic).
        ("4ch DMA kernel",         f32(keys[8], (4, 64, 128)),   True,  None),
        ("4ch DMA unaligned",      f32(keys[9], (4, 24, 40)),    True,  None),
        ("4ch DMA uint8",          u8(keys[10], (4, 32, 48)),    True,  None),
    ]

    ok = True
    for name, x, force, trows in cases:
        y = to_three_channels(x, force_pallas=force, _tile_rows=trows)
        jax.block_until_ready(y)
        y_ref = _reference(x)
        if (y.shape != y_ref.shape or y.dtype != y_ref.dtype
                or not bool(jnp.array_equal(y, y_ref))):
            ok = False
            print(f"MISMATCH for case {name}: {y.shape}/{y.dtype} "
                  f"vs {y_ref.shape}/{y_ref.dtype}")

    if ok:
        print("KERNEL_OK")
</pallas_src>

<mosaic_0001>
module attributes {stable_mosaic.version = 11 : i64} {
  func.func @_bcast3_kernel(%arg0: i32, %arg1: memref<1x256x128xf32, #tpu.memory_space<vmem>>, %arg2: memref<3x256x128xf32, #tpu.memory_space<vmem>>) attributes {dimension_semantics = [#tpu.dimension_semantics<parallel>], iteration_bounds = array<i64: 1>, scalar_prefetch = 0 : i64, scratch_operands = 0 : i64, tpu.core_type = #tpu.core_type<tc>, window_params = [{transform_indices = @transform_0, window_bounds = array<i64: 1, 256, 128>}, {transform_indices = @transform_1, window_bounds = array<i64: 3, 256, 128>}]} {
    %c0 = arith.constant 0 : index
    %c0_0 = arith.constant 0 : index
    %c0_1 = arith.constant 0 : index
    %0 = vector.load %arg1[%c0, %c0_0, %c0_1] : memref<1x256x128xf32, #tpu.memory_space<vmem>>, vector<1x256x128xf32>
    %1 = vector.shape_cast %0 : vector<1x256x128xf32> to vector<256x128xf32>
    %c0_2 = arith.constant 0 : index
    %c0_3 = arith.constant 0 : index
    %c0_4 = arith.constant 0 : index
    %2 = vector.load %arg2[%c0_2, %c0_3, %c0_4] : memref<3x256x128xf32, #tpu.memory_space<vmem>>, vector<1x256x128xf32>
    %3 = vector.shape_cast %2 : vector<1x256x128xf32> to vector<256x128xf32>
    %4 = vector.shape_cast %1 : vector<256x128xf32> to vector<1x256x128xf32>
    tpu.vector_store %arg2[%c0_2, %c0_3, %c0_4], %4 {strides = array<i32>} : memref<3x256x128xf32, #tpu.memory_space<vmem>>, vector<1x256x128xf32>,
    %c1 = arith.constant 1 : index
    %c0_5 = arith.constant 0 : index
    %c0_6 = arith.constant 0 : index
    %5 = vector.load %arg2[%c1, %c0_5, %c0_6] : memref<3x256x128xf32, #tpu.memory_space<vmem>>, vector<1x256x128xf32>
    %6 = vector.shape_cast %5 : vector<1x256x128xf32> to vector<256x128xf32>
    %7 = vector.shape_cast %1 : vector<256x128xf32> to vector<1x256x128xf32>
    tpu.vector_store %arg2[%c1, %c0_5, %c0_6], %7 {strides = array<i32>} : memref<3x256x128xf32, #tpu.memory_space<vmem>>, vector<1x256x128xf32>,
    %c2 = arith.constant 2 : index
    %c0_7 = arith.constant 0 : index
    %c0_8 = arith.constant 0 : index
    %8 = vector.load %arg2[%c2, %c0_7, %c0_8] : memref<3x256x128xf32, #tpu.memory_space<vmem>>, vector<1x256x128xf32>
    %9 = vector.shape_cast %8 : vector<1x256x128xf32> to vector<256x128xf32>
    %10 = vector.shape_cast %1 : vector<256x128xf32> to vector<1x256x128xf32>
    tpu.vector_store %arg2[%c2, %c0_7, %c0_8], %10 {strides = array<i32>} : memref<3x256x128xf32, #tpu.memory_space<vmem>>, vector<1x256x128xf32>,
    return
  }
  func.func @transform_0(%arg0: i32) -> (i32, i32, i32) {
    %c0_i32 = arith.constant 0 : i32
    %c0_i32_0 = arith.constant 0 : i32
    %c0_i32_1 = arith.constant 0 : i32
    return %c0_i32, %arg0, %c0_i32_0 : i32, i32, i32
  }
  func.func @transform_1(%arg0: i32) -> (i32, i32, i32) {
    %c0_i32 = arith.constant 0 : i32
    %c0_i32_0 = arith.constant 0 : i32
    %c0_i32_1 = arith.constant 0 : i32
    return %c0_i32, %arg0, %c0_i32_0 : i32, i32, i32
  }
}

</mosaic_0001>

<bundles_post_ra>
// kernel: tpu_custom_call.1
= control target key start
LH: loop header
LB: loop body
LE: loop exit
PB: predicated region body
PF: predicated region fallthrough
CT: control target
= control target key end

     0   :  { %6 = vsyncpa [#allocation3], 0  ;;  %s256_s0 = inlined_call_operand.hbm [shape: f32[1,256,128], index: 0, kind: input, shape index: {}]   ;;  %s257_s1 = inlined_call_operand.hbm [shape: f32[3,256,128], index: 1, kind: output, shape index: {}]  }
   0x1   :  { %7 = vsyncpa [#allocation4], 0  ;;  %s12_s8 = sshll.u32 %s256_s0, 4  ;;  %s230_s9 = smov [#allocation2]   ;;  %s13_s8 = int_to_ptr.hbm [resolvable:$true] %s12_s8 }
   0x2   :  { %s14_s10 = sshll.u32 %s230_s9, 4  ;;  %s231_s11 = smov 128   ;;  %s15_s10 = int_to_ptr.vmem [resolvable:$true] %s14_s10 }
   0x3   :  { %s232_s12 = smov 8  }
   0x4   :  { %20 = dma.hbm_to_vmem [thread:$0]  %s13_s8, 4096, %s15_s10, [#allocation3], %s231_s11, %s231_s11, %s232_s12  }
   0x5   :  { %226 = dma.done.wait [#allocation3], 4096  }
   0x6   :  { %227 = vsyncadd [#allocation3], 4294963200  ;;  %v25_v0 = vld [vmem:[#allocation2] sm:$0xff]  ;;  %v26_v1 = vld [vmem:[#allocation2 + $0x8] sm:$0xff]  ;;  %s233_s0 = smov [#allocation5]   ;;  %s161_s16 = sshll.u32 %s257_s1, 4  ;;  %s162_s16 = int_to_ptr.hbm [resolvable:$true] %s161_s16 }
   0x7   :  { %57 = vst [vmem:[#allocation5] sm:$0xff] %v25_v0  ;;  %v27_v2 = vld [vmem:[#allocation2 + $0x10] sm:$0xff]  ;;  %v28_v3 = vld [vmem:[#allocation2 + $0x18] sm:$0xff]  ;;  %v29_v4 = vld [vmem:[#allocation2 + $0x20] sm:$0xff]  ;;  %s159_s13 = sshll.u32 %s233_s0, 4  ;;  %s160_s13 = int_to_ptr.vmem [resolvable:$true] %s159_s13 }
   0x8   :  { %90 = vst [vmem:[#allocation5 + $0x100] sm:$0xff] %v25_v0  ;;  %v30_v5 = vld [vmem:[#allocation2 + $0x28] sm:$0xff]  ;;  %v31_v6 = vld [vmem:[#allocation2 + $0x30] sm:$0xff]  ;;  %v32_v7 = vld [vmem:[#allocation2 + $0x38] sm:$0xff] }
   0x9   :  { %123 = vst [vmem:[#allocation5 + $0x200] sm:$0xff] %v25_v0  ;;  %v33_v8 = vld [vmem:[#allocation2 + $0x40] sm:$0xff]  ;;  %v34_v9 = vld [vmem:[#allocation2 + $0x48] sm:$0xff]  ;;  %v35_v10 = vld [vmem:[#allocation2 + $0x50] sm:$0xff] }
   0xa   :  { %58 = vst [vmem:[#allocation5 + $0x8] sm:$0xff] %v26_v1  ;;  %v36_v11 = vld [vmem:[#allocation2 + $0x58] sm:$0xff]  ;;  %v37_v12 = vld [vmem:[#allocation2 + $0x60] sm:$0xff]  ;;  %v38_v13 = vld [vmem:[#allocation2 + $0x68] sm:$0xff] }
   0xb   :  { %91 = vst [vmem:[#allocation5 + $0x108] sm:$0xff] %v26_v1  ;;  %v39_v14 = vld [vmem:[#allocation2 + $0x70] sm:$0xff]  ;;  %v40_v15 = vld [vmem:[#allocation2 + $0x78] sm:$0xff]  ;;  %v41_v16 = vld [vmem:[#allocation2 + $0x80] sm:$0xff] }
   0xc   :  { %124 = vst [vmem:[#allocation5 + $0x208] sm:$0xff] %v26_v1  ;;  %v42_v17 = vld [vmem:[#allocation2 + $0x88] sm:$0xff]  ;;  %v43_v18 = vld [vmem:[#allocation2 + $0x90] sm:$0xff]  ;;  %v44_v19 = vld [vmem:[#allocation2 + $0x98] sm:$0xff] }
   0xd   :  { %59 = vst [vmem:[#allocation5 + $0x10] sm:$0xff] %v27_v2  ;;  %v45_v20 = vld [vmem:[#allocation2 + $0xa0] sm:$0xff]  ;;  %v46_v21 = vld [vmem:[#allocation2 + $0xa8] sm:$0xff]  ;;  %v47_v22 = vld [vmem:[#allocation2 + $0xb0] sm:$0xff] }
   0xe   :  { %92 = vst [vmem:[#allocation5 + $0x110] sm:$0xff] %v27_v2  ;;  %v48_v23 = vld [vmem:[#allocation2 + $0xb8] sm:$0xff]  ;;  %v49_v24 = vld [vmem:[#allocation2 + $0xc0] sm:$0xff]  ;;  %v50_v25 = vld [vmem:[#allocation2 + $0xc8] sm:$0xff] }
   0xf   :  { %125 = vst [vmem:[#allocation5 + $0x210] sm:$0xff] %v27_v2  ;;  %v51_v26 = vld [vmem:[#allocation2 + $0xd0] sm:$0xff]  ;;  %v52_v27 = vld [vmem:[#allocation2 + $0xd8] sm:$0xff]  ;;  %v53_v28 = vld [vmem:[#allocation2 + $0xe0] sm:$0xff] }
  0x10   :  { %60 = vst [vmem:[#allocation5 + $0x18] sm:$0xff] %v28_v3  ;;  %v54_v29 = vld [vmem:[#allocation2 + $0xe8] sm:$0xff]  ;;  %v55_v30 = vld [vmem:[#allocation2 + $0xf0] sm:$0xff]  ;;  %v56_v31 = vld [vmem:[#allocation2 + $0xf8] sm:$0xff] }
  0x11   :  { %93 = vst [vmem:[#allocation5 + $0x118] sm:$0xff] %v28_v3 }
  0x12   :  { %126 = vst [vmem:[#allocation5 + $0x218] sm:$0xff] %v28_v3 }
  0x13   :  { %61 = vst [vmem:[#allocation5 + $0x20] sm:$0xff] %v29_v4 }
  0x14   :  { %94 = vst [vmem:[#allocation5 + $0x120] sm:$0xff] %v29_v4 }
  0x15   :  { %127 = vst [vmem:[#allocation5 + $0x220] sm:$0xff] %v29_v4 }
  0x16   :  { %62 = vst [vmem:[#allocation5 + $0x28] sm:$0xff] %v30_v5 }
  0x17   :  { %95 = vst [vmem:[#allocation5 + $0x128] sm:$0xff] %v30_v5 }
  0x18   :  { %128 = vst [vmem:[#allocation5 + $0x228] sm:$0xff] %v30_v5 }
  0x19   :  { %63 = vst [vmem:[#allocation5 + $0x30] sm:$0xff] %v31_v6 }
  0x1a   :  { %96 = vst [vmem:[#allocation5 + $0x130] sm:$0xff] %v31_v6 }
  0x1b   :  { %129 = vst [vmem:[#allocation5 + $0x230] sm:$0xff] %v31_v6 }
  0x1c   :  { %64 = vst [vmem:[#allocation5 + $0x38] sm:$0xff] %v32_v7 }
  0x1d   :  { %97 = vst [vmem:[#allocation5 + $0x138] sm:$0xff] %v32_v7 }
  0x1e   :  { %130 = vst [vmem:[#allocation5 + $0x238] sm:$0xff] %v32_v7 }
  0x1f   :  { %65 = vst [vmem:[#allocation5 + $0x40] sm:$0xff] %v33_v8 }
  0x20   :  { %98 = vst [vmem:[#allocation5 + $0x140] sm:$0xff] %v33_v8 }
  0x21   :  { %131 = vst [vmem:[#allocation5 + $0x240] sm:$0xff] %v33_v8 }
  0x22   :  { %66 = vst [vmem:[#allocation5 + $0x48] sm:$0xff] %v34_v9 }
  0x23   :  { %99 = vst [vmem:[#allocation5 + $0x148] sm:$0xff] %v34_v9 }
  0x24   :  { %132 = vst [vmem:[#allocation5 + $0x248] sm:$0xff] %v34_v9 }
  0x25   :  { %67 = vst [vmem:[#allocation5 + $0x50] sm:$0xff] %v35_v10 }
  0x26   :  { %100 = vst [vmem:[#allocation5 + $0x150] sm:$0xff] %v35_v10 }
  0x27   :  { %133 = vst [vmem:[#allocation5 + $0x250] sm:$0xff] %v35_v10 }
  0x28   :  { %68 = vst [vmem:[#allocation5 + $0x58] sm:$0xff] %v36_v11 }
  0x29   :  { %101 = vst [vmem:[#allocation5 + $0x158] sm:$0xff] %v36_v11 }
  0x2a   :  { %134 = vst [vmem:[#allocation5 + $0x258] sm:$0xff] %v36_v11 }
  0x2b   :  { %69 = vst [vmem:[#allocation5 + $0x60] sm:$0xff] %v37_v12 }
  0x2c   :  { %102 = vst [vmem:[#allocation5 + $0x160] sm:$0xff] %v37_v12 }
  0x2d   :  { %135 = vst [vmem:[#allocation5 + $0x260] sm:$0xff] %v37_v12 }
  0x2e   :  { %70 = vst [vmem:[#allocation5 + $0x68] sm:$0xff] %v38_v13 }
  0x2f   :  { %103 = vst [vmem:[#allocation5 + $0x168] sm:$0xff] %v38_v13 }
  0x30   :  { %136 = vst [vmem:[#allocation5 + $0x268] sm:$0xff] %v38_v13 }
  0x31   :  { %71 = vst [vmem:[#allocation5 + $0x70] sm:$0xff] %v39_v14 }
  0x32   :  { %104 = vst [vmem:[#allocation5 + $0x170] sm:$0xff] %v39_v14 }
  0x33   :  { %137 = vst [vmem:[#allocation5 + $0x270] sm:$0xff] %v39_v14 }
  0x34   :  { %72 = vst [vmem:[#allocation5 + $0x78] sm:$0xff] %v40_v15 }
  0x35   :  { %105 = vst [vmem:[#allocation5 + $0x178] sm:$0xff] %v40_v15 }
  0x36   :  { %138 = vst [vmem:[#allocation5 + $0x278] sm:$0xff] %v40_v15 }
  0x37   :  { %73 = vst [vmem:[#allocation5 + $0x80] sm:$0xff] %v41_v16 }
  0x38   :  { %106 = vst [vmem:[#allocation5 + $0x180] sm:$0xff] %v41_v16 }
  0x39   :  { %139 = vst [vmem:[#allocation5 + $0x280] sm:$0xff] %v41_v16 }
  0x3a   :  { %74 = vst [vmem:[#allocation5 + $0x88] sm:$0xff] %v42_v17 }
  0x3b   :  { %107 = vst [vmem:[#allocation5 + $0x188] sm:$0xff] %v42_v17 }
  0x3c   :  { %140 = vst [vmem:[#allocation5 + $0x288] sm:$0xff] %v42_v17 }
  0x3d   :  { %75 = vst [vmem:[#allocation5 + $0x90] sm:$0xff] %v43_v18 }
  0x3e   :  { %108 = vst [vmem:[#allocation5 + $0x190] sm:$0xff] %v43_v18 }
  0x3f   :  { %141 = vst [vmem:[#allocation5 + $0x290] sm:$0xff] %v43_v18 }
  0x40   :  { %76 = vst [vmem:[#allocation5 + $0x98] sm:$0xff] %v44_v19 }
  0x41   :  { %109 = vst [vmem:[#allocation5 + $0x198] sm:$0xff] %v44_v19 }
  0x42   :  { %142 = vst [vmem:[#allocation5 + $0x298] sm:$0xff] %v44_v19 }
  0x43   :  { %77 = vst [vmem:[#allocation5 + $0xa0] sm:$0xff] %v45_v20 }
  0x44   :  { %110 = vst [vmem:[#allocation5 + $0x1a0] sm:$0xff] %v45_v20 }
  0x45   :  { %143 = vst [vmem:[#allocation5 + $0x2a0] sm:$0xff] %v45_v20 }
  0x46   :  { %78 = vst [vmem:[#allocation5 + $0xa8] sm:$0xff] %v46_v21 }
  0x47   :  { %111 = vst [vmem:[#allocation5 + $0x1a8] sm:$0xff] %v46_v21 }
  0x48   :  { %144 = vst [vmem:[#allocation5 + $0x2a8] sm:$0xff] %v46_v21 }
  0x49   :  { %79 = vst [vmem:[#allocation5 + $0xb0] sm:$0xff] %v47_v22 }
  0x4a   :  { %112 = vst [vmem:[#allocation5 + $0x1b0] sm:$0xff] %v47_v22 }
  0x4b   :  { %145 = vst [vmem:[#allocation5 + $0x2b0] sm:$0xff] %v47_v22 }
  0x4c   :  { %80 = vst [vmem:[#allocation5 + $0xb8] sm:$0xff] %v48_v23 }
  0x4d   :  { %113 = vst [vmem:[#allocation5 + $0x1b8] sm:$0xff] %v48_v23 }
  0x4e   :  { %146 = vst [vmem:[#allocation5 + $0x2b8] sm:$0xff] %v48_v23 }
  0x4f   :  { %81 = vst [vmem:[#allocation5 + $0xc0] sm:$0xff] %v49_v24 }
  0x50   :  { %114 = vst [vmem:[#allocation5 + $0x1c0] sm:$0xff] %v49_v24 }
  0x51   :  { %147 = vst [vmem:[#allocation5 + $0x2c0] sm:$0xff] %v49_v24 }
  0x52   :  { %82 = vst [vmem:[#allocation5 + $0xc8] sm:$0xff] %v50_v25 }
  0x53   :  { %115 = vst [vmem:[#allocation5 + $0x1c8] sm:$0xff] %v50_v25 }
  0x54   :  { %148 = vst [vmem:[#allocation5 + $0x2c8] sm:$0xff] %v50_v25 }
  0x55   :  { %83 = vst [vmem:[#allocation5 + $0xd0] sm:$0xff] %v51_v26 }
  0x56   :  { %116 = vst [vmem:[#allocation5 + $0x1d0] sm:$0xff] %v51_v26 }
  0x57   :  { %149 = vst [vmem:[#allocation5 + $0x2d0] sm:$0xff] %v51_v26 }
  0x58   :  { %84 = vst [vmem:[#allocation5 + $0xd8] sm:$0xff] %v52_v27 }
  0x59   :  { %117 = vst [vmem:[#allocation5 + $0x1d8] sm:$0xff] %v52_v27 }
  0x5a   :  { %150 = vst [vmem:[#allocation5 + $0x2d8] sm:$0xff] %v52_v27 }
  0x5b   :  { %85 = vst [vmem:[#allocation5 + $0xe0] sm:$0xff] %v53_v28 }
  0x5c   :  { %118 = vst [vmem:[#allocation5 + $0x1e0] sm:$0xff] %v53_v28 }
  0x5d   :  { %151 = vst [vmem:[#allocation5 + $0x2e0] sm:$0xff] %v53_v28 }
  0x5e   :  { %86 = vst [vmem:[#allocation5 + $0xe8] sm:$0xff] %v54_v29 }
  0x5f   :  { %119 = vst [vmem:[#allocation5 + $0x1e8] sm:$0xff] %v54_v29 }
  0x60   :  { %152 = vst [vmem:[#allocation5 + $0x2e8] sm:$0xff] %v54_v29 }
  0x61   :  { %87 = vst [vmem:[#allocation5 + $0xf0] sm:$0xff] %v55_v30 }
  0x62   :  { %120 = vst [vmem:[#allocation5 + $0x1f0] sm:$0xff] %v55_v30 }
  0x63   :  { %153 = vst [vmem:[#allocation5 + $0x2f0] sm:$0xff] %v55_v30 }
  0x64   :  { %88 = vst [vmem:[#allocation5 + $0xf8] sm:$0xff] %v56_v31 }
  0x65   :  { %121 = vst [vmem:[#allocation5 + $0x1f8] sm:$0xff] %v56_v31 }
  0x66   :  { %154 = vst [vmem:[#allocation5 + $0x2f8] sm:$0xff] %v56_v31 }
  0x67   :  { %167 = dma.vmem_to_hbm [thread:$0]  %s160_s13, 12288, %s162_s16, [#allocation4], %s231_s11, %s231_s11, %s232_s12  }
  0x68   :  { %228 = dma.done.wait [#allocation4], 12288  }
  0x69   :  { %229 = vsyncadd [#allocation4], 4294955008 }
  0x6a   :  { %172 = vsyncpa [#allocation3], 1 }
  0x6b   :  { %173 = vsyncpa [#allocation4], 1 }

</bundles_post_ra>
